<compile_context>
chip_gen: v7x
topology: tpu7x:2x2x1
jax: 0.10.0
libtpu: 0.0.40
codegen_flags: <defaults>
</compile_context>

<pallas_src>
import math
from functools import partial

import jax
import jax.numpy as jnp
from jax import lax
from jax.experimental import pallas as pl
from jax.experimental.pallas import tpu as pltpu


# ---------------------------------------------------------------------------
# Kernels
# ---------------------------------------------------------------------------

def _noisy_linear_train_kernel(x_ref, wmu_ref, wsig_ref, eps_in_ref, eps_out_ref,
                               bmu_ref, bsig_ref, o_ref, acc_ref, *, compute_dtype):
    k = pl.program_id(2)

    @pl.when(k == 0)
    def _init():
        acc_ref[...] = jnp.zeros_like(acc_ref)

    # Factorized noise tile rebuilt on the VPU:
    #   eps_in tile is (tk, 1), eps_out tile is (1, tn) -> broadcast outer product.
    eps = eps_in_ref[...] * eps_out_ref[...]                 # (tk, tn)
    w = wmu_ref[...] + wsig_ref[...] * eps                   # effective W^T tile (tk, tn)
    x = x_ref[...]                                           # (tm, tk)

    acc_ref[...] += lax.dot_general(
        x.astype(compute_dtype), w.astype(compute_dtype),
        dimension_numbers=(((1,), (0,)), ((), ())),
        preferred_element_type=jnp.float32)

    @pl.when(k == pl.num_programs(2) - 1)
    def _finalize():
        # bias_epsilon == eps_out in the factorized-noise module.
        b = bmu_ref[...] + bsig_ref[...] * eps_out_ref[...]  # (1, tn)
        o_ref[...] = (acc_ref[...] + b).astype(o_ref.dtype)


def _noisy_linear_eval_kernel(x_ref, wmu_ref, bmu_ref, o_ref, acc_ref, *, compute_dtype):
    k = pl.program_id(2)

    @pl.when(k == 0)
    def _init():
        acc_ref[...] = jnp.zeros_like(acc_ref)

    acc_ref[...] += lax.dot_general(
        x_ref[...].astype(compute_dtype), wmu_ref[...].astype(compute_dtype),
        dimension_numbers=(((1,), (0,)), ((), ())),
        preferred_element_type=jnp.float32)

    @pl.when(k == pl.num_programs(2) - 1)
    def _finalize():
        o_ref[...] = (acc_ref[...] + bmu_ref[...]).astype(o_ref.dtype)


# ---------------------------------------------------------------------------
# Wrappers
# ---------------------------------------------------------------------------

def _round_up(v, m):
    return -(-v // m) * m


def _pad2(a, rows, cols):
    pr, pc = rows - a.shape[0], cols - a.shape[1]
    if pr or pc:
        a = jnp.pad(a, ((0, pr), (0, pc)))
    return a


def _pick_tiles(B, I, O, tm, tn, tk):
    # Clamp tiles to the (padded) problem dims; lane dims stay multiples of 128,
    # sublane (batch) dim a multiple of 8.
    tm = min(tm, _round_up(B, 8))
    tn = min(tn, _round_up(O, 128))
    tk = min(tk, _round_up(I, 128))
    return tm, tn, tk


def _vmem_limit(tm, tn, tk, n_weight_like):
    # per-K-step f32 footprint: x tile + weight-shaped tiles + small vectors + out tile
    per_step = (tm * tk + n_weight_like * tk * tn + tk + 4 * tn + tm * tn) * 4
    # double-buffered inputs + accumulator + generous headroom, capped under v7x VMEM.
    return int(min(max(3 * per_step + (4 << 20), 16 << 20), 48 << 20))


def noisy_linear_train(x, weight_mu, weight_sigma, eps_in, eps_out,
                       bias_mu, bias_sigma, *, compute_dtype=jnp.float32,
                       tm=128, tn=256, tk=512):
    """Training-mode forward. eps_in: (I,), eps_out: (O,) factorized noise vectors."""
    B, I = x.shape
    O = weight_mu.shape[0]
    tm, tn, tk = _pick_tiles(B, I, O, tm, tn, tk)
    Bp, Ip, Op = _round_up(B, tm), _round_up(I, tk), _round_up(O, tn)

    xp = _pad2(x, Bp, Ip)
    # Pre-transpose weights once to (I, O): MXU contracts the sublane dim of the rhs.
    # TODO(synk): in a real model, store the parameters transposed to avoid this op.
    wmu_t = _pad2(weight_mu.T, Ip, Op)
    wsig_t = _pad2(weight_sigma.T, Ip, Op)
    eps_in_p = _pad2(eps_in.reshape(I, 1), Ip, 1)
    eps_out_p = _pad2(eps_out.reshape(1, O), 1, Op)
    bmu_p = _pad2(bias_mu.reshape(1, O), 1, Op)
    bsig_p = _pad2(bias_sigma.reshape(1, O), 1, Op)

    grid = (Bp // tm, Op // tn, Ip // tk)

    out = pl.pallas_call(
        partial(_noisy_linear_train_kernel, compute_dtype=compute_dtype),
        out_shape=jax.ShapeDtypeStruct((Bp, Op), x.dtype),
        grid_spec=pltpu.PrefetchScalarGridSpec(
            num_scalar_prefetch=0,
            grid=grid,
            in_specs=[
                pl.BlockSpec((tm, tk), lambda i, j, k: (i, k)),   # x
                pl.BlockSpec((tk, tn), lambda i, j, k: (k, j)),   # W_mu^T
                pl.BlockSpec((tk, tn), lambda i, j, k: (k, j)),   # W_sigma^T
                pl.BlockSpec((tk, 1), lambda i, j, k: (k, 0)),    # eps_in column
                pl.BlockSpec((1, tn), lambda i, j, k: (0, j)),    # eps_out row
                pl.BlockSpec((1, tn), lambda i, j, k: (0, j)),    # bias_mu
                pl.BlockSpec((1, tn), lambda i, j, k: (0, j)),    # bias_sigma
            ],
            out_specs=pl.BlockSpec((tm, tn), lambda i, j, k: (i, j)),
            scratch_shapes=[pltpu.VMEM((tm, tn), jnp.float32)],
        ),
        compiler_params=pltpu.CompilerParams(
            dimension_semantics=("parallel", "parallel", "arbitrary"),
            vmem_limit_bytes=_vmem_limit(tm, tn, tk, n_weight_like=2),
        ),
    )(xp, wmu_t, wsig_t, eps_in_p, eps_out_p, bmu_p, bsig_p)

    return out[:B, :O]


def noisy_linear_eval(x, weight_mu, bias_mu, *, compute_dtype=jnp.float32,
                      tm=128, tn=256, tk=512):
    """Eval-mode forward: mu-only kernel (no zero sigma/eps arrays DMA'd)."""
    B, I = x.shape
    O = weight_mu.shape[0]
    tm, tn, tk = _pick_tiles(B, I, O, tm, tn, tk)
    Bp, Ip, Op = _round_up(B, tm), _round_up(I, tk), _round_up(O, tn)

    xp = _pad2(x, Bp, Ip)
    wmu_t = _pad2(weight_mu.T, Ip, Op)
    bmu_p = _pad2(bias_mu.reshape(1, O), 1, Op)

    grid = (Bp // tm, Op // tn, Ip // tk)

    out = pl.pallas_call(
        partial(_noisy_linear_eval_kernel, compute_dtype=compute_dtype),
        out_shape=jax.ShapeDtypeStruct((Bp, Op), x.dtype),
        grid_spec=pltpu.PrefetchScalarGridSpec(
            num_scalar_prefetch=0,
            grid=grid,
            in_specs=[
                pl.BlockSpec((tm, tk), lambda i, j, k: (i, k)),   # x
                pl.BlockSpec((tk, tn), lambda i, j, k: (k, j)),   # W_mu^T
                pl.BlockSpec((1, tn), lambda i, j, k: (0, j)),    # bias_mu
            ],
            out_specs=pl.BlockSpec((tm, tn), lambda i, j, k: (i, j)),
            scratch_shapes=[pltpu.VMEM((tm, tn), jnp.float32)],
        ),
        compiler_params=pltpu.CompilerParams(
            dimension_semantics=("parallel", "parallel", "arbitrary"),
            vmem_limit_bytes=_vmem_limit(tm, tn, tk, n_weight_like=1),
        ),
    )(xp, wmu_t, bmu_p)

    return out[:B, :O]


# ---------------------------------------------------------------------------
# Parameter / noise initialization (plain JAX glue; matches reset_parameters +
# reset_noise).  Note: the factorized eps vectors are kept — never the (O, I)
# outer product.
# ---------------------------------------------------------------------------

def _scale_noise(key, size):
    x = jax.random.normal(key, (size,), dtype=jnp.float32)
    return jnp.sign(x) * jnp.sqrt(jnp.abs(x))


def init_noisy_linear(key, in_features, out_features, sigma_init=0.017):
    k_wmu, k_bmu, k_ein, k_eout = jax.random.split(key, 4)
    mu_range = 1.0 / math.sqrt(in_features)
    weight_mu = jax.random.uniform(
        k_wmu, (out_features, in_features), jnp.float32, -mu_range, mu_range)
    bias_mu = jax.random.uniform(
        k_bmu, (out_features,), jnp.float32, -mu_range, mu_range)
    weight_sigma = jnp.full((out_features, in_features), sigma_init, jnp.float32)
    bias_sigma = jnp.full((out_features,), sigma_init, jnp.float32)
    eps_in = _scale_noise(k_ein, in_features)     # factorized, NOT materialized as (O,I)
    eps_out = _scale_noise(k_eout, out_features)  # also serves as bias_epsilon
    return dict(weight_mu=weight_mu, weight_sigma=weight_sigma,
                bias_mu=bias_mu, bias_sigma=bias_sigma,
                eps_in=eps_in, eps_out=eps_out)


if __name__ == "__main__":
    key = jax.random.PRNGKey(0)
    k_param, k_x = jax.random.split(key)

    batch, in_features, out_features = 8, 32, 64
    params = init_noisy_linear(k_param, in_features, out_features)
    x = jax.random.normal(k_x, (batch, in_features), dtype=jnp.float32)

    # Training-mode forward through the Pallas kernel (f32 MXU path).
    y = jax.block_until_ready(noisy_linear_train(
        x,
        params["weight_mu"], params["weight_sigma"],
        params["eps_in"], params["eps_out"],
        params["bias_mu"], params["bias_sigma"],
    ))

    # Pure-JAX reference (materializes the outer product only for checking).
    w_eff = params["weight_mu"] + params["weight_sigma"] * jnp.outer(
        params["eps_out"], params["eps_in"])
    b_eff = params["bias_mu"] + params["bias_sigma"] * params["eps_out"]
    y_ref = x @ w_eff.T + b_eff

    assert y.shape == (batch, out_features)
    assert jnp.allclose(y, y_ref, atol=1e-5, rtol=1e-5)

    # bf16 MXU path (f32 accumulation) — recommended for production shapes.
    y_bf16 = jax.block_until_ready(noisy_linear_train(
        x,
        params["weight_mu"], params["weight_sigma"],
        params["eps_in"], params["eps_out"],
        params["bias_mu"], params["bias_sigma"],
        compute_dtype=jnp.bfloat16,
    ))
    assert jnp.allclose(y_bf16, y_ref, atol=5e-2, rtol=5e-2)

    # Eval-mode forward (mu-only kernel).
    y_eval = jax.block_until_ready(
        noisy_linear_eval(x, params["weight_mu"], params["bias_mu"]))
    y_eval_ref = x @ params["weight_mu"].T + params["bias_mu"]
    assert jnp.allclose(y_eval, y_eval_ref, atol=1e-5, rtol=1e-5)

    print("KERNEL_OK")
</pallas_src>

<mosaic_0001>
module attributes {stable_mosaic.version = 11 : i64} {
  func.func @_noisy_linear_train_kernel(%arg0: i32, %arg1: i32, %arg2: i32, %arg3: memref<8x128xf32, #tpu.memory_space<vmem>>, %arg4: memref<128x128xf32, #tpu.memory_space<vmem>>, %arg5: memref<128x128xf32, #tpu.memory_space<vmem>>, %arg6: memref<128x1xf32, #tpu.memory_space<vmem>>, %arg7: memref<1x128xf32, #tpu.memory_space<vmem>>, %arg8: memref<1x128xf32, #tpu.memory_space<vmem>>, %arg9: memref<1x128xf32, #tpu.memory_space<vmem>>, %arg10: memref<8x128xf32, #tpu.memory_space<vmem>>, %arg11: memref<8x128xf32, #tpu.memory_space<vmem>>) attributes {dimension_semantics = [#tpu.dimension_semantics<parallel>, #tpu.dimension_semantics<parallel>, #tpu.dimension_semantics<arbitrary>], iteration_bounds = array<i64: 1, 1, 1>, scalar_prefetch = 0 : i64, scratch_operands = 1 : i64, tpu.core_type = #tpu.core_type<tc>, window_params = [{transform_indices = @transform_0, window_bounds = array<i64: 8, 128>}, {transform_indices = @transform_1, window_bounds = array<i64: 128, 128>}, {transform_indices = @transform_2, window_bounds = array<i64: 128, 128>}, {transform_indices = @transform_3, window_bounds = array<i64: 128, 1>}, {transform_indices = @transform_4, window_bounds = array<i64: 1, 128>}, {transform_indices = @transform_5, window_bounds = array<i64: 1, 128>}, {transform_indices = @transform_6, window_bounds = array<i64: 1, 128>}, {transform_indices = @transform_7, window_bounds = array<i64: 8, 128>}]} {
    %c0_i32 = arith.constant 0 : i32
    %0 = arith.cmpi eq, %arg2, %c0_i32 : i32
    %1 = arith.extui %0 : i1 to i32
    %c0_i32_0 = arith.constant 0 : i32
    %2 = arith.cmpi ne, %1, %c0_i32_0 : i32
    scf.if %2 {
      %cst_16 = arith.constant 0.000000e+00 : f32
      %20 = vector.broadcast %cst_16 : f32 to vector<8x128xf32>
      %c0_17 = arith.constant 0 : index
      %c0_18 = arith.constant 0 : index
      %21 = vector.load %arg11[%c0_17, %c0_18] : memref<8x128xf32, #tpu.memory_space<vmem>>, vector<8x128xf32>
      tpu.vector_store %arg11[%c0_17, %c0_18], %20 {strides = array<i32>} : memref<8x128xf32, #tpu.memory_space<vmem>>, vector<8x128xf32>,
    } else {
    }
    %c0 = arith.constant 0 : index
    %c0_1 = arith.constant 0 : index
    %3 = vector.load %arg6[%c0, %c0_1] : memref<128x1xf32, #tpu.memory_space<vmem>>, vector<128x1xf32>
    %c0_2 = arith.constant 0 : index
    %c0_3 = arith.constant 0 : index
    %4 = vector.load %arg7[%c0_2, %c0_3] : memref<1x128xf32, #tpu.memory_space<vmem>>, vector<1x128xf32>
    %5 = vector.broadcast %3 : vector<128x1xf32> to vector<128x128xf32>
    %6 = vector.broadcast %4 : vector<1x128xf32> to vector<128x128xf32>
    %7 = arith.mulf %5, %6 : vector<128x128xf32>
    %c0_4 = arith.constant 0 : index
    %c0_5 = arith.constant 0 : index
    %8 = vector.load %arg4[%c0_4, %c0_5] : memref<128x128xf32, #tpu.memory_space<vmem>>, vector<128x128xf32>
    %c0_6 = arith.constant 0 : index
    %c0_7 = arith.constant 0 : index
    %9 = vector.load %arg5[%c0_6, %c0_7] : memref<128x128xf32, #tpu.memory_space<vmem>>, vector<128x128xf32>
    %10 = arith.mulf %9, %7 : vector<128x128xf32>
    %11 = arith.addf %8, %10 : vector<128x128xf32>
    %c0_8 = arith.constant 0 : index
    %c0_9 = arith.constant 0 : index
    %12 = vector.load %arg3[%c0_8, %c0_9] : memref<8x128xf32, #tpu.memory_space<vmem>>, vector<8x128xf32>
    %c0_10 = arith.constant 0 : index
    %c0_11 = arith.constant 0 : index
    %13 = vector.load %arg11[%c0_10, %c0_11] : memref<8x128xf32, #tpu.memory_space<vmem>>, vector<8x128xf32>
    %cst = arith.constant dense<0.000000e+00> : vector<8x128xf32>
    %14 = tpu.matmul %12, %11, %cst {dimension_numbers = #tpu.dot_dimension_numbers<[1], [0], [0], [1], [0, 0, 1, 1], [], []>} : vector<8x128xf32>, vector<128x128xf32>, vector<8x128xf32> -> vector<8x128xf32>
    %15 = arith.addf %13, %14 : vector<8x128xf32>
    %c0_12 = arith.constant 0 : index
    %c0_13 = arith.constant 0 : index
    %16 = vector.load %arg11[%c0_12, %c0_13] : memref<8x128xf32, #tpu.memory_space<vmem>>, vector<8x128xf32>
    tpu.vector_store %arg11[%c0_12, %c0_13], %15 {strides = array<i32>} : memref<8x128xf32, #tpu.memory_space<vmem>>, vector<8x128xf32>,
    %c0_i32_14 = arith.constant 0 : i32
    %17 = arith.cmpi eq, %arg2, %c0_i32_14 : i32
    %18 = arith.extui %17 : i1 to i32
    %c0_i32_15 = arith.constant 0 : i32
    %19 = arith.cmpi ne, %18, %c0_i32_15 : i32
    scf.if %19 {
      %c0_16 = arith.constant 0 : index
      %c0_17 = arith.constant 0 : index
      %20 = vector.load %arg8[%c0_16, %c0_17] : memref<1x128xf32, #tpu.memory_space<vmem>>, vector<1x128xf32>
      %c0_18 = arith.constant 0 : index
      %c0_19 = arith.constant 0 : index
      %21 = vector.load %arg9[%c0_18, %c0_19] : memref<1x128xf32, #tpu.memory_space<vmem>>, vector<1x128xf32>
      %c0_20 = arith.constant 0 : index
      %c0_21 = arith.constant 0 : index
      %22 = vector.load %arg7[%c0_20, %c0_21] : memref<1x128xf32, #tpu.memory_space<vmem>>, vector<1x128xf32>
      %23 = arith.mulf %21, %22 : vector<1x128xf32>
      %24 = arith.addf %20, %23 : vector<1x128xf32>
      %c0_22 = arith.constant 0 : index
      %c0_23 = arith.constant 0 : index
      %25 = vector.load %arg11[%c0_22, %c0_23] : memref<8x128xf32, #tpu.memory_space<vmem>>, vector<8x128xf32>
      %26 = vector.broadcast %24 : vector<1x128xf32> to vector<8x128xf32>
      %27 = arith.addf %25, %26 : vector<8x128xf32>
      %c0_24 = arith.constant 0 : index
      %c0_25 = arith.constant 0 : index
      %28 = vector.load %arg10[%c0_24, %c0_25] : memref<8x128xf32, #tpu.memory_space<vmem>>, vector<8x128xf32>
      tpu.vector_store %arg10[%c0_24, %c0_25], %27 {strides = array<i32>} : memref<8x128xf32, #tpu.memory_space<vmem>>, vector<8x128xf32>,
    } else {
    }
    return
  }
  func.func @transform_0(%arg0: i32, %arg1: i32, %arg2: i32) -> (i32, i32) {
    %c0_i32 = arith.constant 0 : i32
    return %arg0, %arg2 : i32, i32
  }
  func.func @transform_1(%arg0: i32, %arg1: i32, %arg2: i32) -> (i32, i32) {
    %c0_i32 = arith.constant 0 : i32
    return %arg2, %arg1 : i32, i32
  }
  func.func @transform_2(%arg0: i32, %arg1: i32, %arg2: i32) -> (i32, i32) {
    %c0_i32 = arith.constant 0 : i32
    return %arg2, %arg1 : i32, i32
  }
  func.func @transform_3(%arg0: i32, %arg1: i32, %arg2: i32) -> (i32, i32) {
    %c0_i32 = arith.constant 0 : i32
    %c0_i32_0 = arith.constant 0 : i32
    return %arg2, %c0_i32 : i32, i32
  }
  func.func @transform_4(%arg0: i32, %arg1: i32, %arg2: i32) -> (i32, i32) {
    %c0_i32 = arith.constant 0 : i32
    %c0_i32_0 = arith.constant 0 : i32
    return %c0_i32, %arg1 : i32, i32
  }
  func.func @transform_5(%arg0: i32, %arg1: i32, %arg2: i32) -> (i32, i32) {
    %c0_i32 = arith.constant 0 : i32
    %c0_i32_0 = arith.constant 0 : i32
    return %c0_i32, %arg1 : i32, i32
  }
  func.func @transform_6(%arg0: i32, %arg1: i32, %arg2: i32) -> (i32, i32) {
    %c0_i32 = arith.constant 0 : i32
    %c0_i32_0 = arith.constant 0 : i32
    return %c0_i32, %arg1 : i32, i32
  }
  func.func @transform_7(%arg0: i32, %arg1: i32, %arg2: i32) -> (i32, i32) {
    %c0_i32 = arith.constant 0 : i32
    return %arg0, %arg1 : i32, i32
  }
}

</mosaic_0001>

<bundles_post_ra>
// kernel: tpu_custom_call.1
= control target key start
LH: loop header
LB: loop body
LE: loop exit
PB: predicated region body
PF: predicated region fallthrough
CT: control target
= control target key end

     0   :  { %12 = vsyncpa [#allocation4], 0  ;;  %s734_s0 = inlined_call_operand.hbm [shape: f32[8,128], index: 0, kind: input, shape index: {}]   ;;  %s735_s1 = inlined_call_operand.vmem [shape: f32[128,128], index: 1, kind: input, shape index: {}]   ;;  %s736_s2 = inlined_call_operand.hbm [shape: f32[128,128], index: 2, kind: input, shape index: {}]   ;;  %s737_s3 = inlined_call_operand.vmem [shape: f32[128,1], index: 3, kind: input, shape index: {}]   ;;  %s738_s4 = inlined_call_operand.vmem [shape: f32[1,128], index: 4, kind: input, shape index: {}]   ;;  %s739_s5 = inlined_call_operand.vmem [shape: f32[1,128], index: 5, kind: input, shape index: {}]   ;;  %s740_s6 = inlined_call_operand.vmem [shape: f32[1,128], index: 6, kind: input, shape index: {}]   ;;  %s741_s7 = inlined_call_operand.hbm [shape: f32[8,128], index: 7, kind: output, shape index: {}]  }
   0x1   :  { %13 = vsyncpa [#allocation7], 0 }
   0x2   :  { %14 = vsyncpa [#allocation5], 0  ;;  %s508_s24 = smov [#allocation3]   ;;  %s509_s26 = smov [#allocation6]  }
   0x3   :  { %s21_s25 = sshll.u32 %s508_s24, 4  ;;  %s32_s27 = sshll.u32 %s509_s26, 4  ;;  %s22_s25 = int_to_ptr.vmem [resolvable:$true] %s21_s25  ;;  %s557_s27 = int_to_ptr.vmem [resolvable:$true] %s32_s27 }
   0x4   :  { %s436_s30 = scalar_lea.hbm %s734_s0, 128 }
   0x5   :  { %p437_p0 = scmp.ne.s32.totalorder %s734_s0, %s436_s30  ;;  %p440_p1 = scmp.lt.u32.totalorder %s436_s30, %s734_s0 }
   0x7   :  { %p442_p2 = pnand %p440_p1, %p437_p0 }
   0x9   :  { %445 = shalt.err (!%p442_p2)
}
   0xa   :  { %s446_s12 = scalar_lea.vmem %s22_s25, 128  ;;  %p451_p4 = scmp.lt.s32.totalorder %s22_s25, %s22_s25 }
   0xb   :  { %p447_p3 = scmp.ne.s32.totalorder %s22_s25, %s446_s12  ;;  %p452_p5 = scmp.lt.s32.totalorder %s446_s12, %s446_s12 }
   0xd   :  { %p453_p6 = por %p452_p5, %p451_p4 }
   0xf   :  { %p454_p7 = pnand %p453_p6, %p447_p3 }
  0x11   :  { %457 = shalt.err (!%p454_p7)
}
  0x12   :  { %24 = dma.hbm_to_vmem [thread:$0]  %s734_s0, 128, %s22_s25, [#allocation4]  }
  0x13   :  { %s458_s17 = scalar_lea.hbm %s736_s2, 2048 }
  0x14   :  { %p459_p8 = scmp.ne.s32.totalorder %s736_s2, %s458_s17  ;;  %p462_p9 = scmp.lt.u32.totalorder %s458_s17, %s736_s2 }
  0x16   :  { %p464_p10 = pnand %p462_p9, %p459_p8 }
  0x18   :  { %467 = shalt.err (!%p464_p10)
}
  0x19   :  { %s468_s22 = scalar_lea.vmem %s557_s27, 2048  ;;  %p473_p12 = scmp.lt.s32.totalorder %s557_s27, %s557_s27 }
  0x1a   :  { %p469_p11 = scmp.ne.s32.totalorder %s557_s27, %s468_s22  ;;  %p474_p13 = scmp.lt.s32.totalorder %s468_s22, %s468_s22 }
  0x1c   :  { %p475_p0 = por %p474_p13, %p473_p12 }
  0x1e   :  { %p476_p1 = pnand %p475_p0, %p469_p11 }
  0x20   :  { %479 = shalt.err (!%p476_p1)
}
  0x21   :  { %s510_s0 = smov 128   ;;  %s511_s23 = smov 8  }
  0x22   :  { %38 = dma.hbm_to_vmem [thread:$0]  %s736_s2, 2048, %s557_s27, [#allocation7], %s510_s0, %s510_s0, %s511_s23  }
  0x23   :  { %502 = dma.done.wait [#allocation4], 128  }
  0x24   :  { %503 = vsyncadd [#allocation4], 4294967168 }
  0x25   :  { %504 = dma.done.wait [#allocation7], 2048  }
  0x26   :  { %505 = vsyncadd [#allocation7], 4294965248  ;;  %v512_v0 = vmov 0   ;;  %v60_v1 = vld [vmem:[%s737_s3 + $0x10] sm:$0xff]  ;;  %v58_v2 = vld [vmem:[%s737_s3] sm:$0xff]  ;;  %v513_v9 = vmov 0.0|0.0  }
  0x27   :  { %435 = vset.pattern.permute.xlu1 %v512_v0  ;;  %434 = vset.pattern.permute.xlu0 %v512_v0  ;;  %v61_v3 = vld [vmem:[%s737_s3 + $0x18] sm:$0xff]  ;;  %v59_v4 = vld [vmem:[%s737_s3 + $0x8] sm:$0xff]  ;;  %v62_v6 = vld [vmem:[%s737_s3 + $0x20] sm:$0xff]  ;;  %vm514_vm0 = vmmov 0   ;;  %v515_v18 = vmov 0.0   ;;  %s516_s21 = smov [#allocation8]  }
  0x28   :  { %87 = vperm.xlu1 %435, %v60_v1   ;;  %77 = vperm.xlu0 %434, %v58_v2   ;;  %v63_v5 = vld [vmem:[%s737_s3 + $0x28] sm:$0xff]  ;;  %v65_v7 = vld [vmem:[%s737_s3 + $0x38] sm:$0xff]  ;;  %v64_v8 = vld [vmem:[%s737_s3 + $0x30] sm:$0xff]  ;;  %s338_s22 = sshll.u32 %s516_s21, 4  ;;  %s339_s22 = int_to_ptr.vmem [resolvable:$true] %s338_s22 }
  0x29   :  { %401 = vmatprep.subr.bf16.mxu0 %v513_v9  ;;  %v67_v10 = vld [vmem:[%s737_s3 + $0x48] sm:$0xff]  ;;  %v66_v11 = vld [vmem:[%s737_s3 + $0x40] sm:$0xff]  ;;  %v69_v12 = vld [vmem:[%s737_s3 + $0x58] sm:$0xff]  ;;  %398 = vmatprep.mubr.msk.f32.mxu0 %vm514_vm0, %v515_v18  ;;  %p485_p3 = scmp.lt.s32.totalorder %s339_s22, %s339_s22 }
  0x2a   :  { %v68_v13 = vld [vmem:[%s737_s3 + $0x50] sm:$0xff]  ;;  %v71_v14 = vld [vmem:[%s737_s3 + $0x68] sm:$0xff]  ;;  %v70_v15 = vld [vmem:[%s737_s3 + $0x60] sm:$0xff] }
  0x2b   :  { %v73_v16 = vld [vmem:[%s737_s3 + $0x78] sm:$0xff]  ;;  %v72_v17 = vld [vmem:[%s737_s3 + $0x70] sm:$0xff]  ;;  %v640_v19 = vld [vmem:[%s738_s4] ss:$0 sm:$0xff] }
  0x2c   :  { %92 = vperm.xlu1 %435, %v61_v3   ;;  %82 = vperm.xlu0 %434, %v59_v4   ;;  %v193_v24 = vld [vmem:[#allocation6] sm:$0xff]  ;;  %v195_v25 = vld [vmem:[#allocation6 + $0x10] sm:$0xff]  ;;  %v196_v26 = vld [vmem:[#allocation6 + $0x18] sm:$0xff] }
  0x2d   :  { %v194_v28 = vld [vmem:[#allocation6 + $0x8] sm:$0xff]  ;;  %v177_v34 = vld [vmem:[%s735_s1] sm:$0xff]  ;;  %v178_v35 = vld [vmem:[%s735_s1 + $0x8] sm:$0xff] }
  0x2e   :  { %v179_v36 = vld [vmem:[%s735_s1 + $0x10] sm:$0xff]  ;;  %v180_v37 = vld [vmem:[%s735_s1 + $0x18] sm:$0xff]  ;;  %v197_v42 = vld [vmem:[#allocation6 + $0x20] sm:$0xff] }
  0x2f   :  { %v198_v40 = vld [vmem:[#allocation6 + $0x28] sm:$0xff]  ;;  %v182_v50 = vld [vmem:[%s735_s1 + $0x28] sm:$0xff]  ;;  %v181_v54 = vld [vmem:[%s735_s1 + $0x20] sm:$0xff] }
  0x30   :  { %102 = vperm.xlu1 %435, %v63_v5   ;;  %97 = vperm.xlu0 %434, %v62_v6   ;;  %v200_v55 = vld [vmem:[#allocation6 + $0x38] sm:$0xff]  ;;  %v199_v57 = vld [vmem:[#allocation6 + $0x30] sm:$0xff]  ;;  %v183_v2 = vld [vmem:[%s735_s1 + $0x30] sm:$0xff] }
  0x31   :  { %v184_v0 = vld [vmem:[%s735_s1 + $0x38] sm:$0xff]  ;;  %v202_v4 = vld [vmem:[#allocation6 + $0x48] sm:$0xff]  ;;  %v201_v6 = vld [vmem:[#allocation6 + $0x40] sm:$0xff] }
  0x32   :  { %v204_v18 = vld [vmem:[#allocation6 + $0x58] sm:$0xff] }
  0x34   :  { %112 = vperm.xlu1 %435, %v65_v7   ;;  %107 = vperm.xlu0 %434, %v64_v8  }
  0x38   :  { %122 = vperm.xlu1 %435, %v67_v10   ;;  %117 = vperm.xlu0 %434, %v66_v11  }
  0x3c   :  { %132 = vperm.xlu1 %435, %v69_v12   ;;  %127 = vperm.xlu0 %434, %v68_v13   ;;  %v186_v13 = vld [vmem:[%s735_s1 + $0x48] sm:$0xff] }
  0x40   :  { %142 = vperm.xlu1 %435, %v71_v14   ;;  %137 = vperm.xlu0 %434, %v70_v15  }
  0x44   :  { %152 = vperm.xlu1 %435, %v73_v16   ;;  %147 = vperm.xlu0 %434, %v72_v17   ;;  %v185_v17 = vld [vmem:[%s735_s1 + $0x40] sm:$0xff] }
  0xa7   :  { %v88_v20 = vpop.permute.xlu1 %87  ;;  %v78_v21 = vpop.permute.xlu0 %77 }
  0xa8   :  { %v161_v22 = vmul.f32 %v640_v19, %v78_v21  ;;  %v163_v23 = vmul.f32 %v640_v19, %v88_v20  ;;  %v203_v21 = vld [vmem:[#allocation6 + $0x50] sm:$0xff] }
  0xaa   :  { %v209_v30 = vmul.f32 %v193_v24, %v161_v22  ;;  %v211_v33 = vmul.f32 %v195_v25, %v163_v23 }
  0xab   :  { %v93_v27 = vpop.permute.xlu1 %92  ;;  %v83_v29 = vpop.permute.xlu0 %82 }
  0xac   :  { %v164_v31 = vmul.f32 %v640_v19, %v93_v27  ;;  %v162_v32 = vmul.f32 %v640_v19, %v83_v29  ;;  %v225_v46 = vadd.f32 %v209_v30, %v177_v34  ;;  %v227_v48 = vadd.f32 %v211_v33, %v179_v36  ;;  %v187_v30 = vld [vmem:[%s735_s1 + $0x50] sm:$0xff]  ;;  %v205_v34 = vld [vmem:[#allocation6 + $0x60] sm:$0xff] }
  0xae   :  { %v212_v38 = vmul.f32 %v196_v26, %v164_v31  ;;  %v210_v39 = vmul.f32 %v194_v28, %v162_v32  ;;  %v188_v28 = vld [vmem:[%s735_s1 + $0x58] sm:$0xff]  ;;  %v206_v32 = vld [vmem:[#allocation6 + $0x68] sm:$0xff] }
  0xaf   :  { %v103_v41 = vpop.permute.xlu1 %102  ;;  %v98_v43 = vpop.permute.xlu0 %97 }
  0xb0   :  { %v166_v44 = vmul.f32 %v640_v19, %v103_v41  ;;  %v165_v45 = vmul.f32 %v640_v19, %v98_v43  ;;  %v226_v47 = vadd.f32 %v210_v39, %v178_v35  ;;  %v228_v49 = vadd.f32 %v212_v38, %v180_v37 }
  0xb2   :  { %v214_v51 = vmul.f32 %v198_v40, %v166_v44  ;;  %v213_v52 = vmul.f32 %v197_v42, %v165_v45  ;;  %v402_v53 = vpack.c.bf16 %v226_v47, %v225_v46  ;;  %v405_v61 = vpack.c.bf16 %v228_v49, %v227_v48  ;;  %v190_v40 = vld [vmem:[%s735_s1 + $0x68] sm:$0xff]  ;;  %v189_v44 = vld [vmem:[%s735_s1 + $0x60] sm:$0xff]  ;;  %v207_v47 = vld [vmem:[#allocation6 + $0x70] sm:$0xff] }
  0xb3   :  { %v113_v56 = vpop.permute.xlu1 %112  ;;  %v108_v58 = vpop.permute.xlu0 %107  ;;  %v208_v45 = vld [vmem:[#allocation6 + $0x78] sm:$0xff] }
  0xb4   :  { %v168_v59 = vmul.f32 %v640_v19, %v113_v56  ;;  %v167_v60 = vmul.f32 %v640_v19, %v108_v58  ;;  %403 = vmatpush3.bf16.msra.mxu0 %v402_v53  ;;  %v230_v62 = vadd.f32 %v214_v51, %v182_v50  ;;  %v229_v63 = vadd.f32 %v213_v52, %v181_v54  ;;  %v192_v56 = vld [vmem:[%s735_s1 + $0x78] sm:$0xff] }
  0xb5   :  { %404 = vmatprep.subr.bf16.mxu0 %v513_v9 }
  0xb6   :  { %v216_v1 = vmul.f32 %v200_v55, %v168_v59  ;;  %v215_v3 = vmul.f32 %v199_v57, %v167_v60  ;;  %v408_v16 = vpack.c.bf16 %v230_v62, %v229_v63  ;;  %v191_v57 = vld [vmem:[%s735_s1 + $0x70] sm:$0xff]  ;;  %v325_v62 = vlaneseq  ;;  %v319_v63 = vld [vmem:[%s740_s6] sm:$0x1]  ;;  %s480_s6 = scalar_lea.vmem %s339_s22, 128 }
  0xb7   :  { %v123_v5 = vpop.permute.xlu1 %122  ;;  %v118_v7 = vpop.permute.xlu0 %117  ;;  %p481_p2 = scmp.ne.s32.totalorder %s339_s22, %s480_s6  ;;  %p486_p4 = scmp.lt.s32.totalorder %s480_s6, %s480_s6 }
  0xb8   :  { %v170_v8 = vmul.f32 %v640_v19, %v123_v5  ;;  %v169_v10 = vmul.f32 %v640_v19, %v118_v7  ;;  %406 = vmatpush3.bf16.msra.mxu0 %v405_v61  ;;  %v232_v11 = vadd.f32 %v216_v1, %v184_v0  ;;  %v231_v12 = vadd.f32 %v215_v3, %v183_v2  ;;  %v241_v61 = vld [vmem:[#allocation3] sm:$0xff] }
  0xb9   :  { %407 = vmatprep.subr.bf16.mxu0 %v513_v9  ;;  %v320_v0 = vld [vmem:[%s738_s4] sm:$0x1]  ;;  %v326_v2 = vshrl.u32 %v325_v62, 7  ;;  %p487_p5 = por %p486_p4, %p485_p3 }
  0xba   :  { %v218_v14 = vmul.f32 %v202_v4, %v170_v8  ;;  %v217_v15 = vmul.f32 %v201_v6, %v169_v10  ;;  %v411_v25 = vpack.c.bf16 %v232_v11, %v231_v12  ;;  %v321_v1 = vmul.f32 %v320_v0, %v319_v63  ;;  %v318_v3 = vld [vmem:[%s739_s5] sm:$0x1] }
  0xbb   :  { %v133_v20 = vpop.permute.xlu1 %132  ;;  %v128_v22 = vpop.permute.xlu0 %127  ;;  %v327_v4 = vsub.s32 0, %v326_v2  ;;  %p488_p6 = pnand %p487_p5, %p481_p2 }
  0xbc   :  { %v172_v23 = vmul.f32 %v640_v19, %v133_v20  ;;  %v171_v24 = vmul.f32 %v640_v19, %v128_v22  ;;  %409 = vmatpush3.bf16.msra.mxu0 %v408_v16  ;;  %v234_v26 = vadd.f32 %v218_v14, %v186_v13  ;;  %v233_v27 = vadd.f32 %v217_v15, %v185_v17 }
  0xbd   :  { %410 = vmatprep.subr.bf16.mxu0 %v513_v9 }
  0xbe   :  { %v220_v29 = vmul.f32 %v204_v18, %v172_v23  ;;  %v219_v31 = vmul.f32 %v203_v21, %v171_v24  ;;  %v414_v43 = vpack.c.bf16 %v234_v26, %v233_v27 }
  0xbf   :  { %v143_v33 = vpop.permute.xlu1 %142  ;;  %v138_v35 = vpop.permute.xlu0 %137 }
  0xc0   :  { %v174_v36 = vmul.f32 %v640_v19, %v143_v33  ;;  %v173_v37 = vmul.f32 %v640_v19, %v138_v35  ;;  %412 = vmatpush3.bf16.msra.mxu0 %v411_v25  ;;  %v236_v38 = vadd.f32 %v220_v29, %v188_v28  ;;  %v235_v39 = vadd.f32 %v219_v31, %v187_v30 }
  0xc1   :  { %413 = vmatprep.subr.bf16.mxu0 %v513_v9 }
  0xc2   :  { %v222_v41 = vmul.f32 %v206_v32, %v174_v36  ;;  %v221_v42 = vmul.f32 %v205_v34, %v173_v37  ;;  %v417_v51 = vpack.c.bf16 %v236_v38, %v235_v39 }
  0xc3   :  { %v153_v46 = vpop.permute.xlu1 %152  ;;  %v148_v48 = vpop.permute.xlu0 %147 }
  0xc4   :  { %v176_v49 = vmul.f32 %v640_v19, %v153_v46  ;;  %v175_v50 = vmul.f32 %v640_v19, %v148_v48  ;;  %415 = vmatpush3.bf16.msra.mxu0 %v414_v43  ;;  %v238_v52 = vadd.f32 %v222_v41, %v190_v40  ;;  %v237_v53 = vadd.f32 %v221_v42, %v189_v44 }
  0xc5   :  { %416 = vmatprep.subr.bf16.mxu0 %v513_v9 }
  0xc6   :  { %v224_v54 = vmul.f32 %v208_v45, %v176_v49  ;;  %v223_v55 = vmul.f32 %v207_v47, %v175_v50  ;;  %v420_v59 = vpack.c.bf16 %v238_v52, %v237_v53 }
  0xc8   :  { %418 = vmatpush3.bf16.msra.mxu0 %v417_v51  ;;  %v240_v19 = vadd.f32 %v224_v54, %v192_v56  ;;  %v239_v58 = vadd.f32 %v223_v55, %v191_v57 }
  0xc9   :  { %419 = vmatprep.subr.bf16.mxu0 %v513_v9 }
  0xca   :  { %v423_v60 = vpack.c.bf16 %v240_v19, %v239_v58 }
  0xcc   :  { %421 = vmatpush3.bf16.msra.mxu0 %v420_v59 }
  0xcd   :  { %422 = vmatprep.subr.bf16.mxu0 %v513_v9  ;;  %v322_v9 = vadd.f32 %v321_v1, %v318_v3 }
  0xcf   :  { %v328_v5 = vrot.slane %v322_v9, %v327_v4 }
  0xd0   :  { %424 = vmatpush3.bf16.msra.mxu0 %v423_v60 }
  0xd3   :  { %399 = vmatmul.mubr.f32.vlgmr.msra.gmra.mrb[0].mxu0 %v241_v61 }
 0x1a6   :  { %v309_v6 = vpop.f32.mrb[0].mxu0 }
 0x1a7   :  { %v330_v7 = vadd.f32 %v328_v5, %v309_v6  ;;  %v400_v8 = vpop.f32.mrb[1].mxu0 }
 0x1a9   :  { %331 = vst [vmem:[#allocation8] sm:$0xff] %v330_v7 }
 0x1aa   :  { %491 = shalt.err (!%p488_p6)
}
 0x1ab   :  { %s492_s5 = scalar_lea.hbm %s741_s7, 128 }
 0x1ac   :  { %p493_p7 = scmp.ne.s32.totalorder %s741_s7, %s492_s5  ;;  %p496_p8 = scmp.lt.u32.totalorder %s492_s5, %s741_s7 }
 0x1ae   :  { %p498_p9 = pnand %p496_p8, %p493_p7 }
 0x1b0   :  { %501 = shalt.err (!%p498_p9)
}
 0x1b1   :  { %341 = dma.vmem_to_hbm [thread:$0]  %s339_s22, 128, %s741_s7, [#allocation5]  }
 0x1b2   :  { %506 = dma.done.wait [#allocation5], 128  }
 0x1b3   :  { %507 = vsyncadd [#allocation5], 4294967168 }
 0x1b4   :  { %345 = vsyncpa [#allocation4], 1 }
 0x1b5   :  { %346 = vsyncpa [#allocation7], 1 }
 0x1b6   :  { %347 = vsyncpa [#allocation5], 1 }

</bundles_post_ra>
